<compile_context>
chip_gen: v7x
topology: tpu7x:2x2x1
jax: 0.10.0
libtpu: 0.0.40
codegen_flags: <defaults>
</compile_context>

<pallas_src>
import functools

import jax
import jax.numpy as jnp
from jax.experimental import pallas as pl
from jax.experimental.pallas import tpu as pltpu

LANE = 128                      # TPU vreg lane width
TARGET_TILE_BYTES = 4 << 20     # ~4 MiB output tile (2x buffered = 8 MiB VMEM)
SPLIT_BYTES = 2 << 20           # split into >=2 blocks above this (v7x 2 TCs)


def _round_up(n, m):
    return ((n + m - 1) // m) * m


# ---------------------------------------------------------------------------
# Kernel: broadcast the (1, W) pattern row over a (tm, W) output row tile.
# ---------------------------------------------------------------------------
def broadcast_kernel(v_ref, o_ref):
    o_ref[...] = jnp.broadcast_to(v_ref[...], o_ref.shape)


# ---------------------------------------------------------------------------
# Row broadcast: write `rows` copies of the (1, W) pattern to a (rows, W)
# output.  Pure HBM-write-bound; tiling is sized by bytes, not row count.
# ---------------------------------------------------------------------------
@functools.partial(jax.jit, static_argnames=("rows",))
def _broadcast_rows(pattern, *, rows):
    w = pattern.shape[1]
    dtype = pattern.dtype
    row_bytes = w * dtype.itemsize
    total_bytes = rows * row_bytes

    # Byte-targeted tile: ~TARGET_TILE_BYTES per output tile, multiple of 8.
    target_rows = max(8, (TARGET_TILE_BYTES // row_bytes) // 8 * 8)

    # v7x megacore: once the output is big enough, make sure there are at
    # least 2 grid blocks so "parallel" can shard rows across both TCs.
    if total_bytes >= SPLIT_BYTES:
        half = _round_up(-(-rows // 2), 8)
        target_rows = max(8, min(target_rows, half))

    # Tiny outputs collapse to a single block (block shape == full array dim).
    tm = rows if rows <= target_rows else target_rows
    grid = (pl.cdiv(rows, tm),)

    return pl.pallas_call(
        broadcast_kernel,
        out_shape=jax.ShapeDtypeStruct((rows, w), dtype),
        grid=grid,
        in_specs=[pl.BlockSpec((1, w), lambda i: (0, 0))],
        out_specs=pl.BlockSpec((tm, w), lambda i: (i, 0)),
        compiler_params=pltpu.CompilerParams(
            dimension_semantics=("parallel",)),
        cost_estimate=pl.CostEstimate(
            flops=0,
            transcendentals=0,
            bytes_accessed=total_bytes + row_bytes),
    )(pattern)


# ---------------------------------------------------------------------------
# Module analogue: one-time init prepares the lane-dense pattern(s); __call__
# is the forward pass.
# ---------------------------------------------------------------------------
class FixedVector:
    def __init__(self, vector):
        self.vector = jnp.asarray(vector)
        self.d = int(self.vector.shape[-1])
        # Direct pattern: one logical row, last dim == D (no padding).
        self.row = self.vector.reshape(1, self.d)
        # Packed pattern: 128/D logical copies in one lane-dense 128-lane row.
        if self.d < LANE and LANE % self.d == 0:
            self.copies = LANE // self.d
            self.packed = jnp.tile(self.vector, self.copies).reshape(1, LANE)
        else:
            self.copies = 0
            self.packed = None

    def __call__(self, x):
        if x.ndim == 1:
            # Zero-work path: the module just returns the vector itself.
            return self.vector
        n = int(x.shape[0])
        if self.packed is not None and (n * self.d) % LANE == 0:
            # Packed path: full unmasked 128-lane stores, exact byte count,
            # free contiguous reshape back to (N, D).
            rows = (n * self.d) // LANE
            flat = _broadcast_rows(self.packed, rows=rows)
            return flat.reshape(n, self.d)
        # Fallback: write the natural (N, D) layout directly (no slice pass).
        # TODO(synk): lane widths < 128 that don't divide 128 use masked
        # stores here; acceptable for a zero-FLOP broadcast fallback.
        return _broadcast_rows(self.row, rows=n)


if __name__ == "__main__":
    key = jax.random.PRNGKey(0)
    kx, kv, kv2 = jax.random.split(key, 3)

    # Small shapes consistent with the module: batch N=16, base-output width
    # I=32 (only its leading dim matters), fixed-vector length D=16.
    N, num_inputs, D = 16, 32, 16
    x = jax.random.normal(kx, (N, num_inputs), dtype=jnp.float32)
    vector = jax.random.normal(kv, (D,), dtype=jnp.float32)

    mod = FixedVector(vector)

    # 2-D input path (packed lane-dense kernel): vector repeated N times.
    out = jax.block_until_ready(mod(x))
    ref = jnp.tile(vector.reshape(1, D), (N, 1))  # == torch vector.repeat(N, 1)
    assert out.shape == (N, D)
    assert jnp.array_equal(out, ref)

    # 1-D input path: returns the vector itself.
    out1 = jax.block_until_ready(mod(x[0]))
    assert out1.shape == (D,)
    assert jnp.array_equal(out1, vector)

    # Fallback path (D does not pack into 128 lanes): direct (N, D) writes.
    D2 = 20
    vector2 = jax.random.normal(kv2, (D2,), dtype=jnp.float32)
    mod2 = FixedVector(vector2)
    out2 = jax.block_until_ready(mod2(x))
    ref2 = jnp.tile(vector2.reshape(1, D2), (N, 1))
    assert out2.shape == (N, D2)
    assert jnp.array_equal(out2, ref2)

    print("KERNEL_OK")
</pallas_src>

<mosaic_0001>
module attributes {stable_mosaic.version = 11 : i64} {
  func.func @broadcast_kernel(%arg0: i32, %arg1: memref<1x128xf32, #tpu.memory_space<vmem>>, %arg2: memref<2x128xf32, #tpu.memory_space<vmem>>) attributes {dimension_semantics = [#tpu.dimension_semantics<parallel>], iteration_bounds = array<i64: 1>, scalar_prefetch = 0 : i64, scratch_operands = 0 : i64, tpu.core_type = #tpu.core_type<tc>, window_params = [{pipeline_mode = #tpu.pipeline_mode<synchronous>, transform_indices = @transform_0, window_bounds = array<i64: 1, 128>}, {transform_indices = @transform_1, window_bounds = array<i64: 2, 128>}]} {
    %c0 = arith.constant 0 : index
    %c0_0 = arith.constant 0 : index
    %0 = vector.load %arg1[%c0, %c0_0] : memref<1x128xf32, #tpu.memory_space<vmem>>, vector<1x128xf32>
    %1 = vector.shape_cast %0 : vector<1x128xf32> to vector<1x128xf32>
    %2 = vector.broadcast %1 : vector<1x128xf32> to vector<2x128xf32>
    %c0_1 = arith.constant 0 : index
    %c0_2 = arith.constant 0 : index
    %3 = vector.load %arg2[%c0_1, %c0_2] : memref<2x128xf32, #tpu.memory_space<vmem>>, vector<2x128xf32>
    tpu.vector_store %arg2[%c0_1, %c0_2], %2 {strides = array<i32>} : memref<2x128xf32, #tpu.memory_space<vmem>>, vector<2x128xf32>,
    return
  }
  func.func @transform_0(%arg0: i32) -> (i32, i32) {
    %c0_i32 = arith.constant 0 : i32
    %c0_i32_0 = arith.constant 0 : i32
    %c0_i32_1 = arith.constant 0 : i32
    return %c0_i32, %c0_i32_0 : i32, i32
  }
  func.func @transform_1(%arg0: i32) -> (i32, i32) {
    %c0_i32 = arith.constant 0 : i32
    %c0_i32_0 = arith.constant 0 : i32
    return %arg0, %c0_i32 : i32, i32
  }
}

</mosaic_0001>

<bundles_post_ra>
// kernel: _broadcast_rows.1
= control target key start
LH: loop header
LB: loop body
LE: loop exit
PB: predicated region body
PF: predicated region fallthrough
CT: control target
= control target key end

     0   :  { %6 = vsyncpa [#allocation3], 0  ;;  %s131_s0 = inlined_call_operand.hbm [shape: f32[1,128], index: 0, kind: input, shape index: {}]   ;;  %s132_s1 = inlined_call_operand.hbm [shape: f32[2,128], index: 1, kind: output, shape index: {}]  }
   0x1   :  { %7 = vsyncpa [#allocation4], 0  ;;  %s95_s6 = smov [#allocation2]   ;;  %s47_s10 = scalar_lea.hbm %s131_s0, 16 }
   0x2   :  { %s14_s7 = sshll.u32 %s95_s6, 4  ;;  %p48_p0 = scmp.ne.s32.totalorder %s131_s0, %s47_s10  ;;  %s15_s7 = int_to_ptr.vmem [resolvable:$true] %s14_s7 }
   0x3   :  { %p51_p1 = scmp.lt.u32.totalorder %s47_s10, %s131_s0 }
   0x5   :  { %p53_p2 = pnand %p51_p1, %p48_p0 }
   0x7   :  { %56 = shalt.err (!%p53_p2)
}
   0x8   :  { %s57_s15 = scalar_lea.vmem %s15_s7, 16  ;;  %s61_s16 = scalar_lea.vmem %s15_s7, 32 }
   0x9   :  { %p58_p3 = scmp.ne.s32.totalorder %s15_s7, %s57_s15  ;;  %p62_p4 = scmp.lt.s32.totalorder %s15_s7, %s15_s7 }
   0xa   :  { %p63_p5 = scmp.lt.s32.totalorder %s61_s16, %s57_s15 }
   0xc   :  { %p64_p6 = por %p63_p5, %p62_p4 }
   0xe   :  { %p65_p7 = pnand %p64_p6, %p58_p3 }
  0x10   :  { %68 = shalt.err (!%p65_p7)
}
  0x11   :  { %17 = dma.hbm_to_vmem [thread:$0]  %s131_s0, 16, %s15_s7, [#allocation3]  }
  0x12   :  { %91 = dma.done.wait [#allocation3], 16  }
  0x13   :  { %92 = vsyncadd [#allocation3], 4294967280  ;;  %s96_s19 = smov [#allocation5]   ;;  %v44_v0 = vld [vmem:[#allocation2] ss:$0 sm:$0xff] }
  0x14   :  { %s35_s20 = sshll.u32 %s96_s19, 4  ;;  %28 = vst [vmem:[#allocation5] sm:$0x3] %v44_v0  ;;  %s36_s20 = int_to_ptr.vmem [resolvable:$true] %s35_s20 }
  0x15   :  { %s69_s21 = scalar_lea.vmem %s36_s20, 32  ;;  %p74_p9 = scmp.lt.s32.totalorder %s36_s20, %s36_s20 }
  0x16   :  { %p70_p8 = scmp.ne.s32.totalorder %s36_s20, %s69_s21  ;;  %p75_p10 = scmp.lt.s32.totalorder %s69_s21, %s69_s21 }
  0x18   :  { %p76_p11 = por %p75_p10, %p74_p9 }
  0x1a   :  { %p77_p12 = pnand %p76_p11, %p70_p8 }
  0x1c   :  { %80 = shalt.err (!%p77_p12)
}
  0x1d   :  { %s81_s24 = scalar_lea.hbm %s132_s1, 32 }
  0x1e   :  { %p82_p13 = scmp.ne.s32.totalorder %s132_s1, %s81_s24  ;;  %p85_p0 = scmp.lt.u32.totalorder %s81_s24, %s132_s1 }
  0x20   :  { %p87_p1 = pnand %p85_p0, %p82_p13 }
  0x22   :  { %90 = shalt.err (!%p87_p1)
}
  0x23   :  { %38 = dma.vmem_to_hbm [thread:$0]  %s36_s20, 32, %s132_s1, [#allocation4]  }
  0x24   :  { %93 = dma.done.wait [#allocation4], 32  }
  0x25   :  { %94 = vsyncadd [#allocation4], 4294967264 }
  0x26   :  { %42 = vsyncpa [#allocation3], 1 }
  0x27   :  { %43 = vsyncpa [#allocation4], 1 }

</bundles_post_ra>
